<compile_context>
chip_gen: v6e
topology: v6e:2x2x1
jax: 0.10.0
libtpu: 0.0.40
codegen_flags: <defaults>
</compile_context>

<pallas_src>
import functools
from typing import NamedTuple

import jax
import jax.numpy as jnp
from jax.experimental import pallas as pl
from jax.experimental.pallas import tpu as pltpu


def _round_up(x: int, m: int) -> int:
    return ((x + m - 1) // m) * m


class RNNCellParams(NamedTuple):
    w_x: jax.Array      # [Kx_pad, H_pad], compute dtype, zero padded
    w_h: jax.Array      # [Kh_pad, H_pad], compute dtype, zero padded
    b: jax.Array        # [1, H_pad], float32, zero padded
    input_size: int
    hidden: int
    tn: int
    tk: int


def _rnn_cell_kernel(x_ref, h_ref, wx_ref, wh_ref, b_ref, out_ref, acc_ref, *,
                     nkx: int):
    """One (n, k) grid step of  out = tanh([x, h] @ W + b).

    Grid = (N_tiles, K_tiles).  K blocks [0, nkx) contract x against W_x,
    K blocks [nkx, nk) contract h against W_h.  The f32 accumulator lives in
    VMEM scratch, is initialized with the bias at k == 0 (no per-iteration
    broadcast-add) and finalized with tanh + one lane-dense store at the last k.
    """
    k = pl.program_id(1)
    nk = pl.num_programs(1)

    @pl.when(k == 0)
    def _init():
        # Bias folded into the accumulator init (broadcast over batch rows).
        acc_ref[...] = jnp.broadcast_to(b_ref[...].astype(jnp.float32),
                                        acc_ref.shape)

    @pl.when(k < nkx)
    def _acc_x():
        acc_ref[...] += jnp.dot(x_ref[...], wx_ref[...],
                                preferred_element_type=jnp.float32)

    @pl.when(k >= nkx)
    def _acc_h():
        acc_ref[...] += jnp.dot(h_ref[...], wh_ref[...],
                                preferred_element_type=jnp.float32)

    @pl.when(k == nk - 1)
    def _finalize():
        # tanh in f32 on the EUP, single lane-dense store of the output tile.
        out_ref[...] = jnp.tanh(acc_ref[...]).astype(out_ref.dtype)


def rnn_cell_prepare(weight, bias, input_size, hidden, *,
                     compute_dtype=jnp.float32, tn=None, tk=None):
    """One-time parameter setup: split the concatenated weight into W_x / W_h,
    zero-pad to tile-aligned shapes and cast to the MXU operand dtype.

    Doing this once (outside any per-step loop) avoids re-slicing / re-reading
    the weight from HBM on every cell call.
    """
    assert weight.shape == (input_size + hidden, hidden)
    assert bias.shape == (1, hidden)

    # Lane-dense, 128-aligned tiles (fit every chip's VMEM budget with margin).
    if tn is None:
        tn = min(512, _round_up(hidden, 128))
    if tk is None:
        tk = min(512, _round_up(max(input_size, hidden), 128))

    kx_pad = _round_up(max(input_size, 1), tk)
    kh_pad = _round_up(max(hidden, 1), tk)
    h_pad = _round_up(hidden, tn)

    w_x = jnp.zeros((kx_pad, h_pad), compute_dtype)
    w_x = w_x.at[:input_size, :hidden].set(
        weight[:input_size, :].astype(compute_dtype))
    w_h = jnp.zeros((kh_pad, h_pad), compute_dtype)
    w_h = w_h.at[:hidden, :hidden].set(
        weight[input_size:, :].astype(compute_dtype))
    b = jnp.zeros((1, h_pad), jnp.float32)
    b = b.at[:, :hidden].set(bias.astype(jnp.float32))

    return RNNCellParams(w_x=w_x, w_h=w_h, b=b, input_size=input_size,
                         hidden=hidden, tn=tn, tk=tk)


def rnn_cell_step(x, state_old, params: RNNCellParams, *,
                  out_dtype=jnp.float32):
    """One RNN cell forward step: tanh(cat([x, h]) @ W + b)."""
    B, input_size = x.shape
    hidden = state_old.shape[1]
    assert input_size == params.input_size and hidden == params.hidden

    tn, tk = params.tn, params.tk
    kx_pad, h_pad = params.w_x.shape
    kh_pad = params.w_h.shape[0]
    bp = _round_up(B, 8)                        # keep M as one padded block
    cdt = params.w_x.dtype

    # Pad activations (tiny next to W; for real shapes this is usually a no-op).
    x_p = jnp.pad(x.astype(cdt), ((0, bp - B), (0, kx_pad - input_size)))
    h_p = jnp.pad(state_old.astype(cdt), ((0, bp - B), (0, kh_pad - hidden)))

    nj = h_pad // tn
    nkx = kx_pad // tk
    nkh = kh_pad // tk
    nk = nkx + nkh

    kernel = functools.partial(_rnn_cell_kernel, nkx=nkx)

    grid_spec = pltpu.PrefetchScalarGridSpec(
        num_scalar_prefetch=0,
        grid=(nj, nk),
        in_specs=[
            # x blocks: only advance during the x-phase; clamped afterwards so
            # the resident block is not re-fetched during the h-phase.
            pl.BlockSpec((bp, tk),
                         lambda j, k, nkx=nkx: (0, jnp.minimum(k, nkx - 1))),
            # h blocks: pinned to block 0 during the x-phase, then advance.
            pl.BlockSpec((bp, tk),
                         lambda j, k, nkx=nkx: (0, jnp.maximum(k - nkx, 0))),
            # W_x blocks follow the x-phase k index.
            pl.BlockSpec((tk, tn),
                         lambda j, k, nkx=nkx: (jnp.minimum(k, nkx - 1), j)),
            # W_h blocks follow the h-phase k index.
            pl.BlockSpec((tk, tn),
                         lambda j, k, nkx=nkx: (jnp.maximum(k - nkx, 0), j)),
            # bias tile (fetched once per j; index independent of k).
            pl.BlockSpec((1, tn), lambda j, k: (0, j)),
        ],
        out_specs=pl.BlockSpec((bp, tn), lambda j, k: (0, j)),
        scratch_shapes=[pltpu.VMEM((bp, tn), jnp.float32)],
    )

    out_p = pl.pallas_call(
        kernel,
        out_shape=jax.ShapeDtypeStruct((bp, h_pad), out_dtype),
        grid_spec=grid_spec,
        compiler_params=pltpu.CompilerParams(
            dimension_semantics=("parallel", "arbitrary"),
            vmem_limit_bytes=32 * 1024 * 1024,
        ),
    )(x_p, h_p, params.w_x, params.w_h, params.b)

    return out_p[:B, :hidden]


def rnn_simple_cell(x, state_old, weight, bias, *, compute_dtype=jnp.float32,
                    out_dtype=jnp.float32):
    """Convenience wrapper (prepares params every call).  For a step loop,
    call rnn_cell_prepare() once and rnn_cell_step() per step instead."""
    B, input_size = x.shape
    hidden = state_old.shape[1]
    params = rnn_cell_prepare(weight, bias, input_size, hidden,
                              compute_dtype=compute_dtype)
    return rnn_cell_step(x, state_old, params, out_dtype=out_dtype)


if __name__ == "__main__":
    # Small shapes consistent with the module's forward.
    batch = 2
    input_size = 16
    hidden = 32

    key = jax.random.PRNGKey(0)
    k_x, k_h, k_w = jax.random.split(key, 3)

    # Deterministic parameter init mirroring __init__:
    #   weight ~ N(0, 1/(input_size+hidden)), bias = 0
    n = input_size + hidden
    weight = jax.random.normal(k_w, (n, hidden), dtype=jnp.float32) / jnp.sqrt(n)
    bias = jnp.zeros((1, hidden), dtype=jnp.float32)

    x = jax.random.normal(k_x, (batch, input_size), dtype=jnp.float32)
    state_old = jax.random.normal(k_h, (batch, hidden), dtype=jnp.float32)

    # Pure-JAX reference (same math as the PyTorch module).
    ref = jnp.tanh(jnp.concatenate([x, state_old], axis=1) @ weight + bias)

    # f32 path: exact verification.
    params_f32 = rnn_cell_prepare(weight, bias, input_size, hidden,
                                  compute_dtype=jnp.float32)
    out_f32 = jax.block_until_ready(rnn_cell_step(x, state_old, params_f32))
    assert out_f32.shape == (batch, hidden)
    assert jnp.allclose(out_f32, ref, atol=1e-5, rtol=1e-5)

    # bf16-operand / f32-accumulate fast path (v6e/v7x MXU-native), looser tol.
    params_bf16 = rnn_cell_prepare(weight, bias, input_size, hidden,
                                   compute_dtype=jnp.bfloat16)
    out_bf16 = jax.block_until_ready(rnn_cell_step(x, state_old, params_bf16))
    assert out_bf16.shape == (batch, hidden)
    assert jnp.allclose(out_bf16, ref, atol=3e-2, rtol=3e-2)

    print("KERNEL_OK")
</pallas_src>

<mosaic_0001>
module attributes {stable_mosaic.version = 11 : i64} {
  func.func @_rnn_cell_kernel(%arg0: i32, %arg1: i32, %arg2: memref<8x128xf32, #tpu.memory_space<vmem>>, %arg3: memref<8x128xf32, #tpu.memory_space<vmem>>, %arg4: memref<128x128xf32, #tpu.memory_space<vmem>>, %arg5: memref<128x128xf32, #tpu.memory_space<vmem>>, %arg6: memref<1x128xf32, #tpu.memory_space<vmem>>, %arg7: memref<8x128xf32, #tpu.memory_space<vmem>>, %arg8: memref<8x128xf32, #tpu.memory_space<vmem>>) attributes {dimension_semantics = [#tpu.dimension_semantics<parallel>, #tpu.dimension_semantics<arbitrary>], iteration_bounds = array<i64: 1, 2>, scalar_prefetch = 0 : i64, scratch_operands = 1 : i64, tpu.core_type = #tpu.core_type<tc>, window_params = [{transform_indices = @transform_0, window_bounds = array<i64: 8, 128>}, {transform_indices = @transform_1, window_bounds = array<i64: 8, 128>}, {transform_indices = @transform_2, window_bounds = array<i64: 128, 128>}, {transform_indices = @transform_3, window_bounds = array<i64: 128, 128>}, {transform_indices = @transform_4, window_bounds = array<i64: 1, 128>}, {transform_indices = @transform_5, window_bounds = array<i64: 8, 128>}]} {
    %c0_i32 = arith.constant 0 : i32
    %0 = arith.cmpi eq, %arg1, %c0_i32 : i32
    %1 = arith.extui %0 : i1 to i32
    %c0_i32_0 = arith.constant 0 : i32
    %2 = arith.cmpi ne, %1, %c0_i32_0 : i32
    scf.if %2 {
      %c0 = arith.constant 0 : index
      %c0_6 = arith.constant 0 : index
      %12 = vector.load %arg6[%c0, %c0_6] : memref<1x128xf32, #tpu.memory_space<vmem>>, vector<1x128xf32>
      %13 = vector.shape_cast %12 : vector<1x128xf32> to vector<1x128xf32>
      %14 = vector.broadcast %13 : vector<1x128xf32> to vector<8x128xf32>
      %c0_7 = arith.constant 0 : index
      %c0_8 = arith.constant 0 : index
      %15 = vector.load %arg8[%c0_7, %c0_8] : memref<8x128xf32, #tpu.memory_space<vmem>>, vector<8x128xf32>
      tpu.vector_store %arg8[%c0_7, %c0_8], %14 {strides = array<i32>} : memref<8x128xf32, #tpu.memory_space<vmem>>, vector<8x128xf32>,
    } else {
    }
    %c1_i32 = arith.constant 1 : i32
    %3 = arith.cmpi slt, %arg1, %c1_i32 : i32
    %4 = arith.extui %3 : i1 to i32
    %c0_i32_1 = arith.constant 0 : i32
    %5 = arith.cmpi ne, %4, %c0_i32_1 : i32
    scf.if %5 {
      %c0 = arith.constant 0 : index
      %c0_6 = arith.constant 0 : index
      %12 = vector.load %arg8[%c0, %c0_6] : memref<8x128xf32, #tpu.memory_space<vmem>>, vector<8x128xf32>
      %c0_7 = arith.constant 0 : index
      %c0_8 = arith.constant 0 : index
      %13 = vector.load %arg2[%c0_7, %c0_8] : memref<8x128xf32, #tpu.memory_space<vmem>>, vector<8x128xf32>
      %c0_9 = arith.constant 0 : index
      %c0_10 = arith.constant 0 : index
      %14 = vector.load %arg4[%c0_9, %c0_10] : memref<128x128xf32, #tpu.memory_space<vmem>>, vector<128x128xf32>
      %cst = arith.constant dense<0.000000e+00> : vector<8x128xf32>
      %15 = tpu.matmul %13, %14, %cst {dimension_numbers = #tpu.dot_dimension_numbers<[1], [0], [0], [1], [0, 0, 1, 1], [], []>} : vector<8x128xf32>, vector<128x128xf32>, vector<8x128xf32> -> vector<8x128xf32>
      %16 = arith.addf %12, %15 : vector<8x128xf32>
      %c0_11 = arith.constant 0 : index
      %c0_12 = arith.constant 0 : index
      %17 = vector.load %arg8[%c0_11, %c0_12] : memref<8x128xf32, #tpu.memory_space<vmem>>, vector<8x128xf32>
      tpu.vector_store %arg8[%c0_11, %c0_12], %16 {strides = array<i32>} : memref<8x128xf32, #tpu.memory_space<vmem>>, vector<8x128xf32>,
    } else {
    }
    %c1_i32_2 = arith.constant 1 : i32
    %6 = arith.cmpi sge, %arg1, %c1_i32_2 : i32
    %7 = arith.extui %6 : i1 to i32
    %c0_i32_3 = arith.constant 0 : i32
    %8 = arith.cmpi ne, %7, %c0_i32_3 : i32
    scf.if %8 {
      %c0 = arith.constant 0 : index
      %c0_6 = arith.constant 0 : index
      %12 = vector.load %arg8[%c0, %c0_6] : memref<8x128xf32, #tpu.memory_space<vmem>>, vector<8x128xf32>
      %c0_7 = arith.constant 0 : index
      %c0_8 = arith.constant 0 : index
      %13 = vector.load %arg3[%c0_7, %c0_8] : memref<8x128xf32, #tpu.memory_space<vmem>>, vector<8x128xf32>
      %c0_9 = arith.constant 0 : index
      %c0_10 = arith.constant 0 : index
      %14 = vector.load %arg5[%c0_9, %c0_10] : memref<128x128xf32, #tpu.memory_space<vmem>>, vector<128x128xf32>
      %cst = arith.constant dense<0.000000e+00> : vector<8x128xf32>
      %15 = tpu.matmul %13, %14, %cst {dimension_numbers = #tpu.dot_dimension_numbers<[1], [0], [0], [1], [0, 0, 1, 1], [], []>} : vector<8x128xf32>, vector<128x128xf32>, vector<8x128xf32> -> vector<8x128xf32>
      %16 = arith.addf %12, %15 : vector<8x128xf32>
      %c0_11 = arith.constant 0 : index
      %c0_12 = arith.constant 0 : index
      %17 = vector.load %arg8[%c0_11, %c0_12] : memref<8x128xf32, #tpu.memory_space<vmem>>, vector<8x128xf32>
      tpu.vector_store %arg8[%c0_11, %c0_12], %16 {strides = array<i32>} : memref<8x128xf32, #tpu.memory_space<vmem>>, vector<8x128xf32>,
    } else {
    }
    %c1_i32_4 = arith.constant 1 : i32
    %9 = arith.cmpi eq, %arg1, %c1_i32_4 : i32
    %10 = arith.extui %9 : i1 to i32
    %c0_i32_5 = arith.constant 0 : i32
    %11 = arith.cmpi ne, %10, %c0_i32_5 : i32
    scf.if %11 {
      %c0 = arith.constant 0 : index
      %c0_6 = arith.constant 0 : index
      %12 = vector.load %arg8[%c0, %c0_6] : memref<8x128xf32, #tpu.memory_space<vmem>>, vector<8x128xf32>
      %13 = math.tanh %12 : vector<8x128xf32>
      %c0_7 = arith.constant 0 : index
      %c0_8 = arith.constant 0 : index
      %14 = vector.load %arg7[%c0_7, %c0_8] : memref<8x128xf32, #tpu.memory_space<vmem>>, vector<8x128xf32>
      tpu.vector_store %arg7[%c0_7, %c0_8], %13 {strides = array<i32>} : memref<8x128xf32, #tpu.memory_space<vmem>>, vector<8x128xf32>,
    } else {
    }
    return
  }
  func.func @transform_0(%arg0: i32, %arg1: i32) -> (i32, i32) {
    %c0_i32 = arith.constant 0 : i32
    %0 = arith.minsi %arg1, %c0_i32 : i32
    %c0_i32_0 = arith.constant 0 : i32
    %c0_i32_1 = arith.constant 0 : i32
    return %c0_i32_0, %0 : i32, i32
  }
  func.func @transform_1(%arg0: i32, %arg1: i32) -> (i32, i32) {
    %c1_i32 = arith.constant 1 : i32
    %0 = arith.subi %arg1, %c1_i32 : i32
    %c0_i32 = arith.constant 0 : i32
    %1 = arith.maxsi %0, %c0_i32 : i32
    %c0_i32_0 = arith.constant 0 : i32
    %c0_i32_1 = arith.constant 0 : i32
    return %c0_i32_0, %1 : i32, i32
  }
  func.func @transform_2(%arg0: i32, %arg1: i32) -> (i32, i32) {
    %c0_i32 = arith.constant 0 : i32
    %0 = arith.minsi %arg1, %c0_i32 : i32
    %c0_i32_0 = arith.constant 0 : i32
    return %0, %arg0 : i32, i32
  }
  func.func @transform_3(%arg0: i32, %arg1: i32) -> (i32, i32) {
    %c1_i32 = arith.constant 1 : i32
    %0 = arith.subi %arg1, %c1_i32 : i32
    %c0_i32 = arith.constant 0 : i32
    %1 = arith.maxsi %0, %c0_i32 : i32
    %c0_i32_0 = arith.constant 0 : i32
    return %1, %arg0 : i32, i32
  }
  func.func @transform_4(%arg0: i32, %arg1: i32) -> (i32, i32) {
    %c0_i32 = arith.constant 0 : i32
    %c0_i32_0 = arith.constant 0 : i32
    return %c0_i32, %arg0 : i32, i32
  }
  func.func @transform_5(%arg0: i32, %arg1: i32) -> (i32, i32) {
    %c0_i32 = arith.constant 0 : i32
    %c0_i32_0 = arith.constant 0 : i32
    return %c0_i32, %arg0 : i32, i32
  }
}

</mosaic_0001>

<bundles_post_ra>
// kernel: tpu_custom_call.1
= control target key start
LH: loop header
LB: loop body
LE: loop exit
PB: predicated region body
PF: predicated region fallthrough
CT: control target
= control target key end

     0   :  { %10 = vsyncpa [#allocation4], 0  ;;  %s1533_s0 = inlined_call_operand.hbm [shape: f32[8,128], index: 0, kind: input, shape index: {}]   ;;  %s1534_s1 = inlined_call_operand.hbm [shape: f32[8,128], index: 1, kind: input, shape index: {}]   ;;  %s1535_s2 = inlined_call_operand.hbm [shape: f32[128,128], index: 2, kind: input, shape index: {}]   ;;  %s1536_s3 = inlined_call_operand.hbm [shape: f32[128,128], index: 3, kind: input, shape index: {}]   ;;  %s1537_s4 = inlined_call_operand.vmem [shape: f32[1,128], index: 4, kind: input, shape index: {}]   ;;  %s1538_s5 = inlined_call_operand.hbm [shape: f32[8,128], index: 5, kind: output, shape index: {}]  }
   0x1   :  { %12 = vsyncpa [#allocation4 + $0x1], 0 }
   0x2   :  { %13 = vsyncpa [#allocation7], 0 }
   0x3   :  { %15 = vsyncpa [#allocation7 + $0x1], 0 }
   0x4   :  { %16 = vsyncpa [#allocation10], 0 }
   0x5   :  { %18 = vsyncpa [#allocation10 + $0x1], 0 }
   0x6   :  { %19 = vsyncpa [#allocation5], 0  ;;  %s1292_s18 = smov 0   ;;  %s1294_s19 = smov 0  }
   0x7   :  { %s1296_s20 = smov 0   ;;  %s1298_s21 = smov 0  }
   0x8   :  { %s1300_s22 = smov 0   ;;  %s1302_s23 = smov 0  }
   0x9   :  { %s1304_s24 = smov 0  }
   0xa LB: > { %s1326_s25 = sadd.s32 4294967295, %s1249_s24   ;;  %s34_s26 = sadd.s32 1, %s1245_s23  ;;  %s1249_s24 = sphi %s1304_s24, %s25_s24   ;;  %s1245_s23 = sphi %s1302_s23, %s1557_s23   ;;  %s1241_s22 = sphi %s1300_s22, %s1556_s22   ;;  %s1237_s21 = sphi %s1298_s21, %s1523_s21   ;;  %s1233_s20 = sphi %s1296_s20, %s1555_s20   ;;  %s1229_s19 = sphi %s1294_s19, %s1518_s19   ;;  %s1225_s18 = sphi %s1292_s18, %s1554_s18  }
   0xb   : > { %p35_p0 = scmp.ge.s32.totalorder %s34_s26, 2  ;;  %p56_p1 = scmp.eq.s32.totalorder %s1249_s24, 0 }
   0xc   : > { %p62_p2 = scmp.eq.s32.totalorder %s1326_s25, 0  ;;  %p1221_p3 = scmp.ne.s32.totalorder %s1229_s19, 0 }
   0xd   : > { %s1559_s26 = smov (%p35_p0, %s34_s26), 0  ;;  %p93_p5 = scmp.ne.s32.totalorder %s1229_s19, %s1225_s18 }
   0xe   : > { %p89_p4 = por %p1221_p3, %p56_p1  ;;  %p945_p7 = scmp.lt.s32.totalorder %s1249_s24, 2 }
   0xf   : > { %p1339_p6 = por %p93_p5, %p62_p2  ;;  %s261_s28 = sand.u32 1, %s1249_s24  }
  0x10   : > { %p1347_p8 = pnand %p945_p7, %p89_p4  ;;  %s1251_s30 = smov [#allocation6]  }
  0x11   : > { %s1544_s27 = scalar_select %p1339_p6, 1, 0 }
  0x12   : > { %s1545_s29 = scalar_select %p1347_p8, 1, 0 }
  0x13   : > { %s275_s6 = sshll.u32 %s1251_s30, 4  ;;  %s1351_s7 = scalar_lea.sflag [#allocation7], %s261_s28  ;;  %s276_s6 = int_to_ptr.vmem [resolvable:$true] %s275_s6 }
  0x14   : > { %p1539_p9 = pneg %p1347_p8  ;;  %s1042_s8 = scalar_lea.vmem %s276_s6, 128 }
  0x15   : > { %p1043_p10 = scmp.ne.s32.totalorder %s276_s6, %s1042_s8  ;;  %s1049_s9 = scalar_lea.vmem %s276_s6, 256 }
  0x16   : > { %p1050_p13 = scmp.lt.s32.totalorder %s276_s6, %s276_s6  ;;  %p1051_p0 = scmp.lt.s32.totalorder %s1049_s9, %s1042_s8 }
  0x17   : > { %p1045_p11 = pnand %p1043_p10, %p1539_p9 }
  0x18   : > { %p1052_p3 = por %p1051_p0, %p1050_p13 }
  0x19   : > { %p1046_p12 = pneg %p1045_p11 }
  0x1b   : > { %p1053_p4 = pnand %p1052_p3, %p1046_p12 }
  0x1d   : > { %1056 = shalt.err (!%p1053_p4)
}
  0x1e   : > { %938 = dma.hbm_to_vmem [thread:$0]  (!%p1347_p8), %s1534_s1, 128, %s276_s6, %s1351_s7  }
  0x1f   : > { %p800_p5 = scmp.ge.s32.totalorder %s1249_s24, 1  ;;  %p329_p10 = scmp.lt.s32.totalorder %s1249_s24, 3 }
  0x20   : > { %p1222_p12 = scmp.ne.s32.totalorder %s1237_s21, 0  ;;  %p61_p13 = scmp.ne.s32.totalorder %s1237_s21, %s1233_s20 }
  0x21   : > { %p1366_p11 = pnand %p800_p5, %p329_p10  ;;  %s1252_s14 = smov [#allocation3]  }
  0x22   : > { %p57_p0 = por %p1222_p12, %p56_p1  ;;  %p1377_p3 = por %p62_p2, %p61_p13 }
  0x23   : > { %s1546_s12 = scalar_select %p1366_p11, 1, 0 }
  0x24   : > { %s1547_s13 = scalar_select %p1377_p3, 1, 0 }
  0x25   : > { %s254_s15 = sshll.u32 %s1252_s14, 4  ;;  %p1383_p4 = pnand %p945_p7, %p57_p0  ;;  %s255_s15 = int_to_ptr.vmem [resolvable:$true] %s254_s15 }
  0x26   : > { %s1057_s20 = scalar_lea.hbm %s1533_s0, 128 }
  0x27   : > { %p1058_p1 = scmp.ne.s32.totalorder %s1533_s0, %s1057_s20  ;;  %p1059_p2 = pneg %p1383_p4 }
  0x28   : > { %p1064_p10 = scmp.lt.s32.totalorder %s1057_s20, %s1057_s20 }
  0x29   : > { %p1060_p5 = pnand %p1059_p2, %p1058_p1 }
  0x2b   : > { %p1061_p7 = pneg %p1060_p5 }
  0x2d   : > { %p1066_p12 = pnand %p1064_p10, %p1061_p7 }
  0x2f   : > { %1069 = shalt.err (!%p1066_p12)
}
  0x30   : > { %s1070_s6 = scalar_lea.vmem %s255_s15, 128  ;;  %s1077_s8 = scalar_lea.vmem %s255_s15, 256 }
  0x31   : > { %p1071_p13 = scmp.ne.s32.totalorder %s255_s15, %s1070_s6  ;;  %p1078_p6 = scmp.lt.s32.totalorder %s255_s15, %s255_s15 }
  0x32   : > { %p1079_p3 = scmp.lt.s32.totalorder %s1077_s8, %s1070_s6 }
  0x33   : > { %p1073_p0 = pnand %p1071_p13, %p1059_p2 }
  0x34   : > { %p1080_p11 = por %p1079_p3, %p1078_p6 }
  0x35   : > { %p1074_p9 = pneg %p1073_p0 }
  0x37   : > { %p1081_p8 = pnand %p1080_p11, %p1074_p9 }
  0x39   : > { %1084 = shalt.err (!%p1081_p8)
}
  0x3a   : > { %935 = dma.hbm_to_vmem [thread:$0]  (!%p1383_p4), %s1533_s0, 128, %s255_s15, [#allocation4]  }
  0x3b   : > { %s1253_s11 = smov [#allocation8]   ;;  %s1085_s20 = scalar_lea.hbm %s1535_s2, 2048 }
  0x3c   : > { %s296_s14 = sshll.u32 %s1253_s11, 4  ;;  %p1086_p6 = scmp.ne.s32.totalorder %s1535_s2, %s1085_s20  ;;  %s297_s14 = int_to_ptr.vmem [resolvable:$true] %s296_s14 }
  0x3d   : > { %p1092_p11 = scmp.lt.s32.totalorder %s1085_s20, %s1085_s20 }
  0x3e   : > { %p1088_p8 = pnand %p1086_p6, %p1059_p2 }
  0x40   : > { %p1089_p9 = pneg %p1088_p8 }
  0x42   : > { %p1094_p3 = pnand %p1092_p11, %p1089_p9 }
  0x44   : > { %1097 = shalt.err (!%p1094_p3)
}
  0x45   : > { %s1098_s6 = scalar_lea.vmem %s297_s14, 2048  ;;  %s1105_s15 = scalar_lea.vmem %s297_s14, 4096 }
  0x46   : > { %p1099_p1 = scmp.ne.s32.totalorder %s297_s14, %s1098_s6  ;;  %p1106_p10 = scmp.lt.s32.totalorder %s297_s14, %s297_s14 }
  0x47   : > { %p1107_p12 = scmp.lt.s32.totalorder %s1105_s15, %s1098_s6 }
  0x48   : > { %p1101_p5 = pnand %p1099_p1, %p1059_p2 }
  0x49   : > { %p1108_p13 = por %p1107_p12, %p1106_p10 }
  0x4a   : > { %p1102_p7 = pneg %p1101_p5 }
  0x4c   : > { %p1109_p0 = pnand %p1108_p13, %p1102_p7 }
  0x4e   : > { %1112 = shalt.err (!%p1109_p0)
}
  0x4f   : > { %s1254_s8 = smov 128   ;;  %s1255_s9 = smov 8  }
  0x50   : > { %941 = dma.hbm_to_vmem [thread:$0]  (!%p1383_p4), %s1535_s2, 2048, %s297_s14, %s1351_s7, %s1254_s8, %s1254_s8, %s1255_s9  }
  0x51   : > { %s1256_s17 = smov [#allocation9]   ;;  %p1549_p6 = scmp.ne.s32.totalorder %s1545_s29, 0 }
  0x52   : > { %s321_s18 = sshll.u32 %s1256_s17, 4  ;;  %s322_s18 = int_to_ptr.vmem [resolvable:$true] %s321_s18 }
  0x53   : > { %s1126_s20 = scalar_lea.vmem %s322_s18, 2048  ;;  %p1550_p8 = pneg %p1549_p6 }
  0x54   : > { %p1127_p2 = scmp.ne.s32.totalorder %s322_s18, %s1126_s20  ;;  %s1133_s28 = scalar_lea.vmem %s322_s18, 4096 }
  0x55   : > { %p1134_p3 = scmp.lt.s32.totalorder %s322_s18, %s322_s18  ;;  %p1135_p1 = scmp.lt.s32.totalorder %s1133_s28, %s1126_s20 }
  0x56   : > { %p1129_p9 = pnand %p1127_p2, %p1550_p8 }
  0x57   : > { %p1136_p5 = por %p1135_p1, %p1134_p3 }
  0x58   : > { %p1130_p11 = pneg %p1129_p9 }
  0x5a   : > { %p1137_p7 = pnand %p1136_p5, %p1130_p11 }
  0x5c   : > { %1140 = shalt.err (!%p1137_p7)
}
  0x5d   : > { %944 = dma.hbm_to_vmem [thread:$0]  (!%p1549_p6), %s1536_s3, 2048, %s322_s18, [#allocation10], %s1254_s8, %s1254_s8, %s1255_s9  }
  0x5e   : > { %p1551_p4 = scmp.ne.s32.totalorder %s1546_s12, 0 }
  0x5f   : > { %s335_s7 = sand.u32 (!%p1551_p4), 1, %s1237_s21   ;;  %p1552_p10 = scmp.ne.s32.totalorder (!%p1551_p4), %s1547_s13, 0 }
  0x60   : > { %333 = sbr.rel (%p1551_p4) target bundleno = 632 (0x278), region = 40  ;;  %s801_s14 = sshll.u32 (!%p1551_p4), %s335_s7, 3 }
  0x61   : > { %s336_s6 = scalar_lea.sflag (!%p1551_p4), [#allocation4], %s335_s7  ;;  %s1435_s15 = scalar_lea.vmem (!%p1551_p4), [#allocation3], %s801_s14 }
  0x65   : > { %1202 = dma.done.wait (%p1552_p10), %s336_s6, 128  }
  0x66   : > { %1204 = vsyncadd (%p1552_p10), %s336_s6, 4294967168  ;;  %s344_s29 = sand.u32 1, %s1326_s25   ;;  %s346_s8 = sand.u32 1, %s1229_s19  }
  0x67   : > { %s802_s9 = sshll.u32 %s346_s8, 3  ;;  %s345_s12 = scalar_lea.sflag [#allocation7], %s344_s29 }
  0x68   : > { %s1443_s10 = scalar_lea.vmem [#allocation6], %s802_s9  ;;  %p1553_p12 = scmp.ne.s32.totalorder %s1544_s27, 0 }
  0x6a   : > { %1206 = dma.done.wait (%p1553_p12), %s345_s12, 128  }
  0x6b   : > { %1208 = vsyncadd (%p1553_p12), %s345_s12, 4294967168  ;;  %s803_s11 = sshll.u32 %s335_s7, 7 }
  0x6c   : > { %s1449_s17 = scalar_lea.vmem [#allocation8], %s803_s11 }
  0x6d   : > { %1210 = dma.done.wait (%p1552_p10), %s345_s12, 2048  }
  0x6e   : > { %1212 = vsyncadd (%p1552_p10), %s345_s12, 4294965248  ;;  %s804_s18 = sshll.u32 %s346_s8, 7  ;;  %s363_s20 = scalar_lea.sflag [#allocation10], %s346_s8 }
  0x6f   : > { %s1455_s28 = scalar_lea.vmem [#allocation9], %s804_s18 }
  0x70   : > { %1214 = dma.done.wait (%p1553_p12), %s363_s20, 2048  }
  0x71   : > { %1216 = vsyncadd (%p1553_p12), %s363_s20, 4294965248  ;;  %p805_p13 = scmp.ne.s32.totalorder %s1241_s22, 0 }
  0x73   : > { %424 = sbr.rel (%p805_p13) target bundleno = 122 (0x7a), region = 60 }
  0x78   : > { %v806_v0 = vld [vmem:[%s1537_s4] ss:$0 sm:$0xff] }
  0x79   : > { %432 = vst [vmem:[#allocation2] sm:$0xff] %v806_v0 }
  0x7a PF: > { %p807_p0 = scmp.ge.s32.totalorder %s1241_s22, 1 }
  0x7c   : > { %436 = sbr.rel (%p807_p0) target bundleno = 358 (0x166), region = 64 }
  0x81   : > { %v454_v1 = vld [vmem:[%s1449_s17 + $0x78] sm:$0xff]  ;;  %v1257_v2 = vmov 0.0   ;;  %v453_v3 = vld [vmem:[%s1449_s17 + $0x70] sm:$0xff]  ;;  %vm1258_vm0 = vmmov 0   ;;  %v452_v4 = vld [vmem:[%s1449_s17 + $0x68] sm:$0xff] }
  0x82   : > { %850 = vmatprep.subr.mxu0 %v1257_v2  ;;  %882 = vmatprep.mubr.msk.f32.mxu0 %vm1258_vm0, %v1257_v2  ;;  %v451_v5 = vld [vmem:[%s1449_s17 + $0x60] sm:$0xff]  ;;  %v450_v6 = vld [vmem:[%s1449_s17 + $0x58] sm:$0xff]  ;;  %v449_v7 = vld [vmem:[%s1449_s17 + $0x50] sm:$0xff] }
  0x83   : > { %851 = vmatpush3.msra.mxu0 %v454_v1  ;;  %v448_v8 = vld [vmem:[%s1449_s17 + $0x48] sm:$0xff]  ;;  %v447_v9 = vld [vmem:[%s1449_s17 + $0x40] sm:$0xff]  ;;  %v446_v10 = vld [vmem:[%s1449_s17 + $0x38] sm:$0xff] }
  0x84   : > { %852 = vmatprep.subr.mxu0 %v1257_v2  ;;  %v445_v11 = vld [vmem:[%s1449_s17 + $0x30] sm:$0xff]  ;;  %v444_v12 = vld [vmem:[%s1449_s17 + $0x28] sm:$0xff]  ;;  %v443_v13 = vld [vmem:[%s1449_s17 + $0x20] sm:$0xff] }
  0x85   : > { %853 = vmatpush3.msra.mxu0 %v453_v3  ;;  %v442_v14 = vld [vmem:[%s1449_s17 + $0x18] sm:$0xff]  ;;  %v441_v15 = vld [vmem:[%s1449_s17 + $0x10] sm:$0xff]  ;;  %v440_v16 = vld [vmem:[%s1449_s17 + $0x8] sm:$0xff] }
  0x86   : > { %854 = vmatprep.subr.mxu0 %v1257_v2  ;;  %v439_v17 = vld [vmem:[%s1449_s17] sm:$0xff]  ;;  %v437_v19 = vld [vmem:[#allocation2] sm:$0xff] }
  0x87   : > { %855 = vmatpush3.msra.mxu0 %v452_v4  ;;  %v438_v18 = vld [vmem:[%s1435_s15] sm:$0xff] }
  0x88   : > { %856 = vmatprep.subr.mxu0 %v1257_v2 }
  0x89   : > { %857 = vmatpush3.msra.mxu0 %v451_v5 }
  0x8a   : > { %858 = vmatprep.subr.mxu0 %v1257_v2 }
  0x8b   : > { %859 = vmatpush3.msra.mxu0 %v450_v6 }
  0x8c   : > { %860 = vmatprep.subr.mxu0 %v1257_v2 }
  0x8d   : > { %861 = vmatpush3.msra.mxu0 %v449_v7 }
  0x8e   : > { %862 = vmatprep.subr.mxu0 %v1257_v2 }
  0x8f   : > { %863 = vmatpush3.msra.mxu0 %v448_v8 }
  0x90   : > { %864 = vmatprep.subr.mxu0 %v1257_v2 }
  0x91   : > { %865 = vmatpush3.msra.mxu0 %v447_v9 }
  0x92   : > { %866 = vmatprep.subr.mxu0 %v1257_v2 }
  0x93   : > { %867 = vmatpush3.msra.mxu0 %v446_v10 }
  0x94   : > { %868 = vmatprep.subr.mxu0 %v1257_v2 }
  0x95   : > { %869 = vmatpush3.msra.mxu0 %v445_v11 }
  0x96   : > { %870 = vmatprep.subr.mxu0 %v1257_v2 }
  0x97   : > { %871 = vmatpush3.msra.mxu0 %v444_v12 }
  0x98   : > { %872 = vmatprep.subr.mxu0 %v1257_v2 }
  0x99   : > { %873 = vmatpush3.msra.mxu0 %v443_v13 }
  0x9a   : > { %874 = vmatprep.subr.mxu0 %v1257_v2 }
  0x9b   : > { %875 = vmatpush3.msra.mxu0 %v442_v14 }
  0x9c   : > { %876 = vmatprep.subr.mxu0 %v1257_v2 }
  0x9d   : > { %877 = vmatpush3.msra.mxu0 %v441_v15 }
  0x9e   : > { %878 = vmatprep.subr.mxu0 %v1257_v2 }
  0x9f   : > { %879 = vmatpush3.msra.mxu0 %v440_v16 }
  0xa0   : > { %880 = vmatprep.subr.mxu0 %v1257_v2 }
  0xa1   : > { %881 = vmatpush3.msra.mxu0 %v439_v17 }
  0xa2   : > { %883 = vmatmul.mubr.f32.vlgmr.msra.gmra.mxu0 %v438_v18 }
 0x162   : > { %v521_v20 = vpop.f32.mrf.mxu0 }
 0x163   : > { %v525_v21 = vadd.f32 %v521_v20, %v437_v19 }
 0x164   : > { %v884_v22 = vpop.f32.mrf.mxu0 }
 0x165   : > { %526 = vst [vmem:[#allocation2] sm:$0xff] %v525_v21 }
 0x166 PF: > { %p808_p2 = scmp.lt.s32.totalorder %s1241_s22, 1 }
 0x168   : > { %530 = sbr.rel (%p808_p2) target bundleno = 594 (0x252), region = 68 }
 0x16d   : > { %v548_v23 = vld [vmem:[%s1455_s28 + $0x78] sm:$0xff]  ;;  %v1259_v24 = vmov 0.0   ;;  %v547_v25 = vld [vmem:[%s1455_s28 + $0x70] sm:$0xff]  ;;  %vm1260_vm1 = vmmov 0   ;;  %v546_v26 = vld [vmem:[%s1455_s28 + $0x68] sm:$0xff] }
 0x16e   : > { %885 = vmatprep.subr.mxu0 %v1259_v24  ;;  %917 = vmatprep.mubr.msk.f32.mxu0 %vm1260_vm1, %v1259_v24  ;;  %v545_v27 = vld [vmem:[%s1455_s28 + $0x60] sm:$0xff]  ;;  %v544_v28 = vld [vmem:[%s1455_s28 + $0x58] sm:$0xff]  ;;  %v543_v29 = vld [vmem:[%s1455_s28 + $0x50] sm:$0xff] }
 0x16f   : > { %886 = vmatpush3.msra.mxu0 %v548_v23  ;;  %v542_v30 = vld [vmem:[%s1455_s28 + $0x48] sm:$0xff]  ;;  %v541_v31 = vld [vmem:[%s1455_s28 + $0x40] sm:$0xff]  ;;  %v540_v32 = vld [vmem:[%s1455_s28 + $0x38] sm:$0xff] }
 0x170   : > { %887 = vmatprep.subr.mxu0 %v1259_v24  ;;  %v539_v33 = vld [vmem:[%s1455_s28 + $0x30] sm:$0xff]  ;;  %v538_v34 = vld [vmem:[%s1455_s28 + $0x28] sm:$0xff]  ;;  %v537_v35 = vld [vmem:[%s1455_s28 + $0x20] sm:$0xff] }
 0x171   : > { %888 = vmatpush3.msra.mxu0 %v547_v25  ;;  %v536_v36 = vld [vmem:[%s1455_s28 + $0x18] sm:$0xff]  ;;  %v535_v37 = vld [vmem:[%s1455_s28 + $0x10] sm:$0xff]  ;;  %v534_v38 = vld [vmem:[%s1455_s28 + $0x8] sm:$0xff] }
 0x172   : > { %889 = vmatprep.subr.mxu0 %v1259_v24  ;;  %v533_v39 = vld [vmem:[%s1455_s28] sm:$0xff]  ;;  %v532_v40 = vld [vmem:[%s1443_s10] sm:$0xff] }
 0x173   : > { %890 = vmatpush3.msra.mxu0 %v546_v26  ;;  %v531_v41 = vld [vmem:[#allocation2] sm:$0xff] }
 0x174   : > { %891 = vmatprep.subr.mxu0 %v1259_v24 }
 0x175   : > { %892 = vmatpush3.msra.mxu0 %v545_v27 }
 0x176   : > { %893 = vmatprep.subr.mxu0 %v1259_v24 }
 0x177   : > { %894 = vmatpush3.msra.mxu0 %v544_v28 }
 0x178   : > { %895 = vmatprep.subr.mxu0 %v1259_v24 }
 0x179   : > { %896 = vmatpush3.msra.mxu0 %v543_v29 }
 0x17a   : > { %897 = vmatprep.subr.mxu0 %v1259_v24 }
 0x17b   : > { %898 = vmatpush3.msra.mxu0 %v542_v30 }
 0x17c   : > { %899 = vmatprep.subr.mxu0 %v1259_v24 }
 0x17d   : > { %900 = vmatpush3.msra.mxu0 %v541_v31 }
 0x17e   : > { %901 = vmatprep.subr.mxu0 %v1259_v24 }
 0x17f   : > { %902 = vmatpush3.msra.mxu0 %v540_v32 }
 0x180   : > { %903 = vmatprep.subr.mxu0 %v1259_v24 }
 0x181   : > { %904 = vmatpush3.msra.mxu0 %v539_v33 }
 0x182   : > { %905 = vmatprep.subr.mxu0 %v1259_v24 }
 0x183   : > { %906 = vmatpush3.msra.mxu0 %v538_v34 }
 0x184   : > { %907 = vmatprep.subr.mxu0 %v1259_v24 }
 0x185   : > { %908 = vmatpush3.msra.mxu0 %v537_v35 }
 0x186   : > { %909 = vmatprep.subr.mxu0 %v1259_v24 }
 0x187   : > { %910 = vmatpush3.msra.mxu0 %v536_v36 }
 0x188   : > { %911 = vmatprep.subr.mxu0 %v1259_v24 }
 0x189   : > { %912 = vmatpush3.msra.mxu0 %v535_v37 }
 0x18a   : > { %913 = vmatprep.subr.mxu0 %v1259_v24 }
 0x18b   : > { %914 = vmatpush3.msra.mxu0 %v534_v38 }
 0x18c   : > { %915 = vmatprep.subr.mxu0 %v1259_v24 }
 0x18d   : > { %916 = vmatpush3.msra.mxu0 %v533_v39 }
 0x18e   : > { %918 = vmatmul.mubr.f32.vlgmr.msra.gmra.mxu0 %v532_v40 }
 0x24e   : > { %v615_v42 = vpop.f32.mrf.mxu0 }
 0x24f   : > { %v619_v43 = vadd.f32 %v615_v42, %v531_v41 }
 0x250   : > { %v919_v44 = vpop.f32.mrf.mxu0 }
 0x251   : > { %620 = vst [vmem:[#allocation2] sm:$0xff] %v619_v43 }
 0x252 PF: > { %p809_p6 = scmp.ne.s32.totalorder %s1241_s22, 1 }
 0x254   : > { %624 = sbr.rel (%p809_p6) target bundleno = 617 (0x269), region = 72 }
 0x259   : > { %v625_v45 = vld [vmem:[#allocation2] sm:$0xff] }
 0x25a   : > { %1027 = vtanh.f32 %v625_v45 }
 0x267   : > { %v1028_v46 = vpop.eup %1027 }
 0x268   : > { %627 = vst [vmem:[#allocation11] sm:$0xff] %v1028_v46 }
 0x269 PF: > { %p946_p8 = scmp.eq.s32.totalorder %s1326_s25, 1  ;;  %s1261_s27 = smov [#allocation11]  }
 0x26a   : > { %s637_s13 = sshll.u32 %s1261_s27, 4  ;;  %s638_s13 = int_to_ptr.vmem [resolvable:$true] %s637_s13 }
 0x26b   : > { %s1141_s7 = scalar_lea.vmem %s638_s13, 128  ;;  %p1148_p1 = scmp.lt.s32.totalorder %s638_s13, %s638_s13 }
 0x26c   : > { %p1142_p9 = scmp.ne.s32.totalorder %s638_s13, %s1141_s7  ;;  %p1149_p5 = scmp.lt.s32.totalorder %s1141_s7, %s1141_s7 }
 0x26e   : > { %p1143_p11 = pnand %p1142_p9, %p946_p8  ;;  %p1150_p7 = por %p1149_p5, %p1148_p1 }
 0x270   : > { %p1144_p3 = pneg %p1143_p11 }
 0x272   : > { %p1151_p4 = pnand %p1150_p7, %p1144_p3 }
 0x274   : > { %1154 = shalt.err (!%p1151_p4)
}
 0x275   : > { %929 = dma.vmem_to_hbm [thread:$0]  (%p946_p8), %s638_s13, 128, %s1538_s5, [#allocation5]  }
 0x276   : > { %1218 = dma.done.wait (%p946_p8), [#allocation5], 128  }
 0x277   : > { %1220 = vsyncadd (%p946_p8), [#allocation5], 4294967168 }
 0x278 PF: > { %s25_s24 = sadd.s32 1, %s1249_s24   ;;  %s1554_s18 = smov %s1229_s19 }
 0x279   : > { %p22_p10 = scmp.ge.s32.totalorder %s25_s24, 4   ;;  %s1518_s19 = smov 0  }
 0x27a   : > { %s1555_s20 = smov %s1237_s21  ;;  %s1523_s21 = smov 0  }
 0x27b   : > { %s1556_s22 = smov %s1245_s23  ;;  %s1557_s23 = smov %s1559_s26 }
 0x27c   :  { %24 = sbr.rel (!%p22_p10) target bundleno = 10 (0xa), region = 134 }
 0x281   :  { %650 = vsyncpa [#allocation4], 1 }
 0x282   :  { %652 = vsyncpa [#allocation4 + $0x1], 1 }
 0x283   :  { %653 = vsyncpa [#allocation7], 1 }
 0x284   :  { %655 = vsyncpa [#allocation7 + $0x1], 1 }
 0x285   :  { %656 = vsyncpa [#allocation10], 1 }
 0x286   :  { %658 = vsyncpa [#allocation10 + $0x1], 1 }
 0x287   :  { %659 = vsyncpa [#allocation5], 1 }
 0x288   :  { %661 = vsyncpa [#allocation5 + $0x1], 1 }

</bundles_post_ra>
